<compile_context>
chip_gen: v7x
topology: tpu7x:2x2x1
jax: 0.10.0
libtpu: 0.0.40
codegen_flags: <defaults>
</compile_context>

<pallas_src>
import functools

import jax
import jax.numpy as jnp
from jax.experimental import pallas as pl
from jax.experimental.pallas import tpu as pltpu


def output_layer_kernel(x_ref, w1_ref, b1_ref, w2_ref, b2_ref, mask_ref, o_ref,
                        *, n_batch):
    # x_ref: (B*S, H) matmul-dtype (row = b*S + s).  Two fused 2-D MXU matmuls,
    # f32 accumulation; all elementwise math in f32.
    h = jnp.dot(x_ref[...], w1_ref[...], preferred_element_type=jnp.float32)
    h = jnp.maximum(h + b1_ref[...], 0.0)                          # (B*S, H)  f32

    logits = jnp.dot(h.astype(w2_ref.dtype), w2_ref[...],
                     preferred_element_type=jnp.float32)
    logits = logits + b2_ref[...]                                  # (B*S, Cp) f32

    # Legacy nn.Softmax() with implicit dim on a 3-D (B, S, C) input -> dim=0:
    # normalize over the batch per (sentence, class) column.  View the f32
    # logits as (B, S, Cp) — lane dim untouched, sublane split on a tile
    # boundary when S % 8 == 0 (free; still correct otherwise, just relayouts) —
    # and reduce over axis=0 in one structured max/sum.
    rows, cp = logits.shape
    n_sents = rows // n_batch
    logits3 = logits.reshape(n_batch, n_sents, cp)
    m = jnp.max(logits3, axis=0, keepdims=True)                    # (1, S, Cp)
    e = jnp.exp(logits3 - m)                                       # (B, S, Cp)
    denom = jnp.sum(e, axis=0, keepdims=True)                      # (1, S, Cp)
    probs = (e / denom).reshape(rows, cp)                          # exact divide

    # Mask arrives as (B*S, 1) f32; lane-broadcast against the lane-dense
    # (B*S, Cp) probabilities -> full-vreg unmasked stores.
    o_ref[...] = (probs * mask_ref[...]).astype(o_ref.dtype)


def prepare_output_layer_params(w1, b1, w2, b2, *, matmul_dtype=jnp.bfloat16):
    """One-time parameter prep (cast/pad/reshape).  Hoisted out of the hot path:
    call once, reuse for every forward call."""
    H, C = w2.shape
    Cp = ((C + 127) // 128) * 128          # lane-dense padded class dim
    return dict(
        w1=w1.astype(matmul_dtype),                                            # (H, H)
        b1=b1.reshape(1, H).astype(jnp.float32),                               # (1, H)
        w2=jnp.pad(w2.astype(matmul_dtype), ((0, 0), (0, Cp - C))),            # (H, Cp)
        b2=jnp.pad(b2.reshape(1, C).astype(jnp.float32), ((0, 0), (0, Cp - C))),  # (1, Cp)
        n_classes=C,
        matmul_dtype=matmul_dtype,
    )


def output_layer(params, x, mask_cls):
    """Forward pass.  x: (B, S, H); mask_cls: (B, S) -> returns (B, S, C) f32."""
    B, S, H = x.shape
    C = params["n_classes"]
    Cp = params["w2"].shape[1]
    md = params["matmul_dtype"]

    # Fuse (B, S) into one row axis so each linear layer is a single 2-D matmul.
    x_flat = x.reshape(B * S, H).astype(md)
    # Mask stays tiny: (B*S, 1) f32, broadcast inside the kernel.
    mask1 = mask_cls.astype(jnp.float32).reshape(B * S, 1)

    n = B * S
    op_bytes = jnp.dtype(md).itemsize
    cost = pl.CostEstimate(
        flops=2 * n * H * H + 2 * n * H * Cp,
        transcendentals=n * Cp,
        bytes_accessed=(n * H + H * H + H * Cp) * op_bytes
                       + (H + Cp + n) * 4 + n * Cp * 4,
    )

    kernel = functools.partial(output_layer_kernel, n_batch=B)
    vmem = lambda: pl.BlockSpec(memory_space=pltpu.MemorySpace.VMEM)
    out = pl.pallas_call(
        kernel,
        out_shape=jax.ShapeDtypeStruct((B * S, Cp), jnp.float32),
        in_specs=[vmem() for _ in range(6)],
        out_specs=vmem(),
        cost_estimate=cost,
    )(x_flat, params["w1"], params["b1"], params["w2"], params["b2"], mask1)

    # Drop class padding and restore the (B, S, C) view outside the kernel.
    return out[:, :C].reshape(B, S, C)


if __name__ == "__main__":
    # Small shapes consistent with the module:
    #   batch B = 2, n_sents S = max_src_nsents = 8, hidden H = 32, classifer_dim C = S
    B, S, H = 2, 8, 32
    C = S  # output_type == 'multi' -> classifer_dim = max_src_nsents

    key = jax.random.PRNGKey(0)
    kx, kw1, kb1, kw2, kb2, km = jax.random.split(key, 6)

    x = jax.random.normal(kx, (B, S, H), dtype=jnp.float32)
    bound = 1.0 / (H ** 0.5)  # PyTorch-Linear-like fan_in uniform init
    w1 = jax.random.uniform(kw1, (H, H), minval=-bound, maxval=bound, dtype=jnp.float32)
    b1 = jax.random.uniform(kb1, (H,), minval=-bound, maxval=bound, dtype=jnp.float32)
    w2 = jax.random.uniform(kw2, (H, C), minval=-bound, maxval=bound, dtype=jnp.float32)
    b2 = jax.random.uniform(kb2, (C,), minval=-bound, maxval=bound, dtype=jnp.float32)
    mask_cls = jax.random.uniform(km, (B, S)) > 0.3  # boolean CLS mask

    params = prepare_output_layer_params(w1, b1, w2, b2)           # one-time prep
    out = jax.block_until_ready(output_layer(params, x, mask_cls))

    # Matched-precision pure-JAX reference: bf16 MXU inputs, f32 accumulation,
    # legacy softmax over dim 0 (batch), then CLS-mask multiply.
    xb, w1b, w2b = (x.astype(jnp.bfloat16), w1.astype(jnp.bfloat16),
                    w2.astype(jnp.bfloat16))
    h_ref = jnp.maximum(
        jnp.einsum('bsh,hk->bsk', xb, w1b, preferred_element_type=jnp.float32) + b1,
        0.0)
    logits_ref = jnp.einsum('bsk,kc->bsc', h_ref.astype(jnp.bfloat16), w2b,
                            preferred_element_type=jnp.float32) + b2
    ref = jax.nn.softmax(logits_ref, axis=0) * mask_cls[:, :, None].astype(jnp.float32)

    assert out.shape == (B, S, C)
    err = float(jnp.max(jnp.abs(out - ref)))
    assert jnp.allclose(out, ref, atol=2e-3, rtol=2e-3), err

    print("KERNEL_OK")
</pallas_src>

<mosaic_0001>
module attributes {stable_mosaic.version = 11 : i64} {
  func.func @output_layer_kernel(%arg0: memref<16x32xbf16, #tpu.memory_space<vmem>>, %arg1: memref<32x32xbf16, #tpu.memory_space<vmem>>, %arg2: memref<1x32xf32, #tpu.memory_space<vmem>>, %arg3: memref<32x128xbf16, #tpu.memory_space<vmem>>, %arg4: memref<1x128xf32, #tpu.memory_space<vmem>>, %arg5: memref<16x1xf32, #tpu.memory_space<vmem>>, %arg6: memref<16x128xf32, #tpu.memory_space<vmem>>) attributes {dimension_semantics = [], scalar_prefetch = 0 : i64, scratch_operands = 0 : i64, tpu.core_type = #tpu.core_type<tc>} {
    %c0 = arith.constant 0 : index
    %c0_0 = arith.constant 0 : index
    %0 = vector.load %arg0[%c0, %c0_0] : memref<16x32xbf16, #tpu.memory_space<vmem>>, vector<16x32xbf16>
    %c0_1 = arith.constant 0 : index
    %c0_2 = arith.constant 0 : index
    %1 = vector.load %arg1[%c0_1, %c0_2] : memref<32x32xbf16, #tpu.memory_space<vmem>>, vector<32x32xbf16>
    %cst = arith.constant dense<0.000000e+00> : vector<16x32xf32>
    %2 = tpu.matmul %0, %1, %cst {dimension_numbers = #tpu.dot_dimension_numbers<[1], [0], [0], [1], [0, 0, 1, 1], [], []>} : vector<16x32xbf16>, vector<32x32xbf16>, vector<16x32xf32> -> vector<16x32xf32>
    %c0_3 = arith.constant 0 : index
    %c0_4 = arith.constant 0 : index
    %3 = vector.load %arg2[%c0_3, %c0_4] : memref<1x32xf32, #tpu.memory_space<vmem>>, vector<1x32xf32>
    %4 = vector.broadcast %3 : vector<1x32xf32> to vector<16x32xf32>
    %5 = arith.addf %2, %4 : vector<16x32xf32>
    %cst_5 = arith.constant 0.000000e+00 : f32
    %6 = vector.broadcast %cst_5 : f32 to vector<16x32xf32>
    %7 = arith.maximumf %5, %6 : vector<16x32xf32>
    %8 = arith.truncf %7 : vector<16x32xf32> to vector<16x32xbf16>
    %c0_6 = arith.constant 0 : index
    %c0_7 = arith.constant 0 : index
    %9 = vector.load %arg3[%c0_6, %c0_7] : memref<32x128xbf16, #tpu.memory_space<vmem>>, vector<32x128xbf16>
    %cst_8 = arith.constant dense<0.000000e+00> : vector<16x128xf32>
    %10 = tpu.matmul %8, %9, %cst_8 {dimension_numbers = #tpu.dot_dimension_numbers<[1], [0], [0], [1], [0, 0, 1, 1], [], []>} : vector<16x32xbf16>, vector<32x128xbf16>, vector<16x128xf32> -> vector<16x128xf32>
    %c0_9 = arith.constant 0 : index
    %c0_10 = arith.constant 0 : index
    %11 = vector.load %arg4[%c0_9, %c0_10] : memref<1x128xf32, #tpu.memory_space<vmem>>, vector<1x128xf32>
    %12 = vector.broadcast %11 : vector<1x128xf32> to vector<16x128xf32>
    %13 = arith.addf %10, %12 : vector<16x128xf32>
    %14 = vector.shape_cast %13 : vector<16x128xf32> to vector<2x8x128xf32>
    %cst_11 = arith.constant dense<0xFF800000> : vector<8x128xf32>
    %15 = vector.multi_reduction <maximumf>, %14, %cst_11 [0] : vector<2x8x128xf32> to vector<8x128xf32>
    %16 = vector.shape_cast %15 : vector<8x128xf32> to vector<1x8x128xf32>
    %17 = vector.broadcast %16 : vector<1x8x128xf32> to vector<2x8x128xf32>
    %18 = arith.subf %14, %17 : vector<2x8x128xf32>
    %19 = math.exp %18 : vector<2x8x128xf32>
    %cst_12 = arith.constant dense<0.000000e+00> : vector<8x128xf32>
    %20 = vector.multi_reduction <add>, %19, %cst_12 [0] : vector<2x8x128xf32> to vector<8x128xf32>
    %21 = vector.shape_cast %20 : vector<8x128xf32> to vector<1x8x128xf32>
    %22 = vector.broadcast %21 : vector<1x8x128xf32> to vector<2x8x128xf32>
    %23 = arith.divf %19, %22 : vector<2x8x128xf32>
    %24 = vector.shape_cast %23 : vector<2x8x128xf32> to vector<16x128xf32>
    %c0_13 = arith.constant 0 : index
    %c0_14 = arith.constant 0 : index
    %25 = vector.load %arg5[%c0_13, %c0_14] : memref<16x1xf32, #tpu.memory_space<vmem>>, vector<16x1xf32>
    %26 = vector.broadcast %25 : vector<16x1xf32> to vector<16x128xf32>
    %27 = arith.mulf %24, %26 : vector<16x128xf32>
    %c0_15 = arith.constant 0 : index
    %c0_16 = arith.constant 0 : index
    %28 = vector.load %arg6[%c0_15, %c0_16] : memref<16x128xf32, #tpu.memory_space<vmem>>, vector<16x128xf32>
    tpu.vector_store %arg6[%c0_15, %c0_16], %27 {strides = array<i32>} : memref<16x128xf32, #tpu.memory_space<vmem>>, vector<16x128xf32>,
    return
  }
}

</mosaic_0001>

<bundles_post_ra>
// kernel: tpu_custom_call.1
= control target key start
LH: loop header
LB: loop body
LE: loop exit
PB: predicated region body
PF: predicated region fallthrough
CT: control target
= control target key end

     0   :  { %11 = vsyncpa [#allocation3], 0  ;;  %s469_s0 = inlined_call_operand.hbm [shape: bf16[16,32], index: 0, kind: input, shape index: {}]   ;;  %s470_s1 = inlined_call_operand.vmem [shape: bf16[32,32], index: 1, kind: input, shape index: {}]   ;;  %s471_s2 = inlined_call_operand.vmem [shape: f32[1,32], index: 2, kind: input, shape index: {}]   ;;  %s472_s3 = inlined_call_operand.hbm [shape: bf16[32,128], index: 3, kind: input, shape index: {}]   ;;  %s473_s4 = inlined_call_operand.vmem [shape: f32[1,128], index: 4, kind: input, shape index: {}]   ;;  %s474_s5 = inlined_call_operand.vmem [shape: f32[16,1], index: 5, kind: input, shape index: {}]   ;;  %s475_s6 = inlined_call_operand.hbm [shape: f32[16,128], index: 6, kind: output, shape index: {}]  }
   0x1   :  { %12 = vsyncpa [#allocation6], 0 }
   0x2   :  { %13 = vsyncpa [#allocation4], 0  ;;  %s368_s21 = smov [#allocation2]   ;;  %s296_s25 = scalar_lea.hbm %s469_s0, 128 }
   0x3   :  { %s19_s22 = sshll.u32 %s368_s21, 4  ;;  %p297_p0 = scmp.ne.s32.totalorder %s469_s0, %s296_s25  ;;  %s20_s22 = int_to_ptr.vmem [resolvable:$true] %s19_s22 }
   0x4   :  { %p300_p1 = scmp.lt.u32.totalorder %s296_s25, %s469_s0 }
   0x6   :  { %p302_p2 = pnand %p300_p1, %p297_p0 }
   0x8   :  { %305 = shalt.err (!%p302_p2)
}
   0x9   :  { %s306_s30 = scalar_lea.vmem %s20_s22, 128  ;;  %p311_p4 = scmp.lt.s32.totalorder %s20_s22, %s20_s22 }
   0xa   :  { %p307_p3 = scmp.ne.s32.totalorder %s20_s22, %s306_s30  ;;  %p312_p5 = scmp.lt.s32.totalorder %s306_s30, %s306_s30 }
   0xc   :  { %p313_p6 = por %p312_p5, %p311_p4 }
   0xe   :  { %p314_p7 = pnand %p313_p6, %p307_p3 }
  0x10   :  { %317 = shalt.err (!%p314_p7)
}
  0x11   :  { %s369_s7 = smov 64   ;;  %s370_s8 = smov 4  }
  0x12   :  { %25 = dma.hbm_to_vmem [thread:$0]  %s469_s0, 128, %s20_s22, [#allocation3], %s369_s7, %s369_s7, %s370_s8  }
  0x13   :  { %s371_s11 = smov [#allocation5]   ;;  %s318_s15 = scalar_lea.hbm %s472_s3, 256 }
  0x14   :  { %s35_s12 = sshll.u32 %s371_s11, 4  ;;  %p319_p8 = scmp.ne.s32.totalorder %s472_s3, %s318_s15  ;;  %s36_s12 = int_to_ptr.vmem [resolvable:$true] %s35_s12 }
  0x15   :  { %p322_p9 = scmp.lt.u32.totalorder %s318_s15, %s472_s3 }
  0x17   :  { %p324_p10 = pnand %p322_p9, %p319_p8 }
  0x19   :  { %327 = shalt.err (!%p324_p10)
}
  0x1a   :  { %s328_s20 = scalar_lea.vmem %s36_s12, 256  ;;  %p333_p12 = scmp.lt.s32.totalorder %s36_s12, %s36_s12 }
  0x1b   :  { %p329_p11 = scmp.ne.s32.totalorder %s36_s12, %s328_s20  ;;  %p334_p13 = scmp.lt.s32.totalorder %s328_s20, %s328_s20 }
  0x1d   :  { %p335_p0 = por %p334_p13, %p333_p12 }
  0x1f   :  { %p336_p1 = pnand %p335_p0, %p329_p11 }
  0x21   :  { %339 = shalt.err (!%p336_p1)
}
  0x22   :  { %41 = dma.hbm_to_vmem [thread:$0]  %s472_s3, 256, %s36_s12, [#allocation6], %s369_s7, %s369_s7, %s370_s8  }
  0x23   :  { %362 = dma.done.wait [#allocation3], 128  }
  0x24   :  { %363 = vsyncadd [#allocation3], 4294967168 }
  0x25   :  { %364 = dma.done.wait [#allocation6], 256  }
  0x26   :  { %365 = vsyncadd [#allocation6], 4294967040  ;;  %v372_v0 = vmov 0.0   ;;  %vm373_vm0 = vmmov 0   ;;  %v285_v1 = vld [vmem:[%s470_s1] sm:$0xff]   ;;  %v286_v2 = vld [vmem:[%s470_s1 + $0x8] sm:$0xff]  }
  0x27   :  { %258 = vmatprep.subr.bf16.mxu0 %v372_v0  ;;  %262 = vmatprep.mubr.msk.bf16.mxu0 %vm373_vm0, %v372_v0  ;;  %v287_v3 = vld [vmem:[#allocation2] sm:$0xff]   ;;  %vm83_vm1 = vcmask 261120   ;;  %v288_v4 = vld [vmem:[#allocation5] sm:$0xff]   ;;  %v289_v5 = vld [vmem:[#allocation5 + $0x8] sm:$0xff]   ;;  %v374_v7 = vmov 0  }
  0x28   :  { %266 = vmatprep.subr.bf16.mxu1 %v372_v0  ;;  %270 = vmatprep.mubr.msk.bf16.mxu1 %vm373_vm0, %v372_v0  ;;  %v209_v6 = vld [vmem:[%s474_s5] sm:$0xff]  ;;  %v210_v8 = vld [vmem:[%s474_s5 + $0x8] sm:$0xff] }
  0x29   :  { %259 = vmatpush3.bf16.msra.mxu0 %v285_v1  ;;  %267 = vmatpush3.bf16.msra.mxu1 %v288_v4  ;;  %v243_v9 = vld [vmem:[%s471_s2] ss:$0 sm:$0xff]  ;;  %s375_s2 = smov [#allocation7]  }
  0x2a   :  { %260 = vmatprep.subr.bf16.mxu0 %v372_v0  ;;  %268 = vmatprep.subr.bf16.mxu1 %v372_v0  ;;  %v248_v19 = vld [vmem:[%s473_s4] ss:$0 sm:$0xff]  ;;  %s230_s4 = sshll.u32 %s375_s2, 4  ;;  %s231_s4 = int_to_ptr.vmem [resolvable:$true] %s230_s4 }
  0x2b   :  { %284 = vset.pattern.permute.xlu0 %v374_v7  ;;  %s340_s5 = scalar_lea.vmem %s231_s4, 256  ;;  %p345_p3 = scmp.lt.s32.totalorder %s231_s4, %s231_s4 }
  0x2c   :  { %213 = vperm.xlu0 %284, %v209_v6   ;;  %p341_p2 = scmp.ne.s32.totalorder %s231_s4, %s340_s5  ;;  %p346_p4 = scmp.lt.s32.totalorder %s340_s5, %s340_s5 }
  0x2d   :  { %261 = vmatpush3.bf16.msra.mxu0 %v286_v2  ;;  %269 = vmatpush3.bf16.msra.mxu1 %v289_v5 }
  0x2e   :  { %p347_p5 = por %p346_p4, %p345_p3 }
  0x30   :  { %263 = vmatmul.mubr.msk.bf16.vlgmr.msra.gmra.mrb[0].mxu0 %vm83_vm1, %v287_v3  ;;  %218 = vperm.xlu0 %284, %v210_v8   ;;  %p348_p6 = pnand %p347_p5, %p341_p2 }
  0xab   :  { %v214_v34 = vpop.permute.xlu0 %213 }
  0xaf   :  { %v219_v38 = vpop.permute.xlu0 %218 }
 0x103   :  { %v121_v10 = vpop.f32.mrb[0].mxu0 }
 0x104   :  { %v122_v11 = vadd.f32 %v243_v9, %v121_v10  ;;  %v264_v12 = vpop.f32.mrb[1].mxu0 }
 0x105   :  { %v124_v13 = vpop.f32.mrb[2].mxu0 }
 0x106   :  { %v125_v14 = vadd.f32 %v243_v9, %v124_v13  ;;  %v265_v15 = vpop.f32.mrb[3].mxu0  ;;  %v128_v16 = vmax.f32 %v122_v11, 0.0 }
 0x108   :  { %v129_v17 = vmax.f32 %v125_v14, 0.0 }
 0x10a   :  { %v130_v18 = vpack.c.bf16 %v129_v17, %v128_v16 }
 0x10c   :  { %271 = vmatmul.mubr.msk.bf16.vlgmr.msra.gmra.mrb[0].mxu1 %vm83_vm1, %v130_v18 }
 0x1df   :  { %v191_v20 = vpop.f32.mrb[0].mxu1 }
 0x1e0   :  { %v272_v21 = vpop.f32.mrb[1].mxu1  ;;  %v192_v23 = vadd.f32 %v248_v19, %v191_v20 }
 0x1e1   :  { %v194_v22 = vpop.f32.mrb[2].mxu1 }
 0x1e2   :  { %v195_v24 = vadd.f32 %v248_v19, %v194_v22  ;;  %v273_v25 = vpop.f32.mrb[3].mxu1 }
 0x1e4   :  { %v198_v26 = vmax.f32 %v192_v23, %v195_v24 }
 0x1e6   :  { %v199_v27 = vsub.f32 %v192_v23, %v198_v26  ;;  %v200_v28 = vsub.f32 %v195_v24, %v198_v26 }
 0x1e8   :  { %v201_v29 = vmul.f32 1.442695, %v199_v27  ;;  %v203_v30 = vmul.f32 1.442695, %v200_v28 }
 0x1ea   :  { %290 = vpow2.f32 %v201_v29 }
 0x1eb   :  { %292 = vpow2.f32 %v203_v30 }
 0x1f4   :  { %v291_v31 = vpop.eup %290 }
 0x1f5   :  { %v293_v32 = vpop.eup %292 }
 0x1f6   :  { %v205_v33 = vadd.f32 %v293_v32, %v291_v31 }
 0x1f8   :  { %294 = vrcp.f32 %v205_v33 }
 0x202   :  { %v295_v35 = vpop.eup %294 }
 0x203   :  { %v207_v36 = vmul.f32 %v295_v35, %v291_v31  ;;  %v208_v37 = vmul.f32 %v295_v35, %v293_v32 }
 0x205   :  { %v221_v39 = vmul.f32 %v214_v34, %v207_v36  ;;  %v222_v40 = vmul.f32 %v219_v38, %v208_v37 }
 0x207   :  { %223 = vst [vmem:[#allocation7] sm:$0xff] %v221_v39  ;;  %224 = vst [vmem:[#allocation7 + $0x8] sm:$0xff] %v222_v40 }
 0x208   :  { %351 = shalt.err (!%p348_p6)
}
 0x209   :  { %s352_s10 = scalar_lea.hbm %s475_s6, 256 }
 0x20a   :  { %p353_p7 = scmp.ne.s32.totalorder %s475_s6, %s352_s10  ;;  %p356_p8 = scmp.lt.u32.totalorder %s352_s10, %s475_s6 }
 0x20c   :  { %p358_p9 = pnand %p356_p8, %p353_p7 }
 0x20e   :  { %361 = shalt.err (!%p358_p9)
}
 0x20f   :  { %s376_s15 = smov 128   ;;  %s377_s16 = smov 8  }
 0x210   :  { %236 = dma.vmem_to_hbm [thread:$0]  %s231_s4, 256, %s475_s6, [#allocation4], %s376_s15, %s376_s15, %s377_s16  }
 0x211   :  { %366 = dma.done.wait [#allocation4], 256  }
 0x212   :  { %367 = vsyncadd [#allocation4], 4294967040 }
 0x213   :  { %240 = vsyncpa [#allocation3], 1 }
 0x214   :  { %241 = vsyncpa [#allocation6], 1 }
 0x215   :  { %242 = vsyncpa [#allocation4], 1 }

</bundles_post_ra>
